<compile_context>
chip_gen: v7x
topology: tpu7x:2x2x1
jax: 0.10.0
libtpu: 0.0.40
codegen_flags: <defaults>
</compile_context>

<pallas_src>
import jax
import jax.numpy as jnp
from jax.experimental import pallas as pl
from jax.experimental.pallas import tpu as pltpu

EPS = 1e-7


def _round_up(x, m):
    return ((x + m - 1) // m) * m


def _make_gbms_kernel(D):
    """Kernel factory; D = d*d (true feature width before lane padding).

    Merged-KV column layout (width D+3, zero-padded to 128 lanes):
      cols 0..D-1 : L_j
      col  D      : 1        -> accumulates colsum  = sum_j W[j, m]
      col  D+1    : r_j - 2*eps*s_j   (distance term only; acc col is garbage)
      col  D+2    : g_j = exp(4*c*eps*s_j) -> accumulates gsum (row-sum recovery)
    """
    col_one = D
    col_g = D + 2

    def kernel(q_ref, kvj_ref, kvi_ref, out_ref):
        j = pl.program_id(1)

        @pl.when(j == 0)
        def _():
            out_ref[...] = jnp.zeros_like(out_ref)

        kv = kvj_ref[...]

        # c * ||L_m - L_j + eps||^2 in one MXU pass.  f32 operands: the Gram
        # expansion r_m + r_j - 2*L_m.L_j cancels catastrophically for nearby
        # points, exactly where the weights matter.
        cdist = jax.lax.dot_general(
            q_ref[...], kv,
            dimension_numbers=(((1,), (1,)), ((), ())),
            preferred_element_type=jnp.float32)          # (ti, tj)

        wt = jnp.exp(cdist)                               # Wt[m, j] = W[j, m]
        # (On v6e/v7x only, wt = jnp.exp(cdist.astype(jnp.bfloat16)) is a
        #  further option; not enabled because v5e has no bf16 EUP.)

        # bf16 MXU for the value matmul, f32 accumulation directly into the
        # resident output block (index map (i, 0) across the j axis).
        out_ref[...] += jnp.dot(wt.astype(jnp.bfloat16),
                                kv.astype(jnp.bfloat16),
                                preferred_element_type=jnp.float32)

        @pl.when(j == pl.num_programs(1) - 1)
        def _():
            acc = out_ref[...]
            vi = kvi_ref[...]                             # [L_m, 1, *, g_m, 0..]
            # Same bf16 rounding the MXU consumed -> the j == m self-term
            # cancels exactly in (sum_j Wt L_j) - colsum * L_m.
            vi_sub = vi.astype(jnp.bfloat16).astype(jnp.float32)
            colsum = acc[:, col_one:col_one + 1]          # sum_j W[j, m]
            gsum = acc[:, col_g:col_g + 1]                # sum_j W[j, m] * g_j
            g_i = vi[:, col_g:col_g + 1]                  # g_m (exact f32)
            # rowsum[m] = gsum[m] / g_m  ->  M = num * g_m / gsum
            scale = g_i / gsum                            # once per i-block
            # cols 0..D-1: sum_j W[j,m](L_j - L_m) / rowsum[m];
            # cols >= D are garbage and discarded by the wrapper.
            out_ref[...] = ((acc - colsum * vi_sub) * scale).astype(out_ref.dtype)

    return kernel


def _gbms_mean_shift(L, bandwidth):
    """L: (N, D) float32 flattened matrix logs -> M: (N, D) mean-shift vectors."""
    N, D = L.shape
    dtype = jnp.float32
    L = L.astype(dtype)

    bw = jnp.asarray(bandwidth, dtype)
    c = -0.5 / (bw * bw)                                   # folded into Q below

    r = jnp.sum(L * L, axis=-1, keepdims=True)             # ||L_i||^2
    s = jnp.sum(L, axis=-1, keepdims=True)                 # sum_k L_i[k]
    ones = jnp.ones((N, 1), dtype)
    zeros = jnp.zeros((N, 1), dtype)
    deps2 = D * EPS * EPS
    g = jnp.exp(4.0 * c * EPS * s)                         # (N, 1)

    # Q'_m = c * [-2 L_m, r_m + 2eps s_m + D eps^2, 1, 0]   (0 over the g column)
    Q = c * jnp.concatenate([-2.0 * L, r + 2.0 * EPS * s + deps2, ones, zeros],
                            axis=-1)
    # KV_j = [L_j, 1, r_j - 2eps s_j, g_j] : distance RHS AND value matrix.
    KV = jnp.concatenate([L, ones, r - 2.0 * EPS * s, g], axis=-1)

    DA = _round_up(D + 3, 128)                             # lane-dense width

    # Tile selection: power-of-two row tiles up to 512 (per-step overhead
    # amortization / roofline).  tile_i halved only if that is needed to give
    # the parallel i axis >= 2 blocks (v7x megacore); harmless on v5e/v6e.
    Np8 = _round_up(N, 8)
    tile = 8
    while tile * 2 <= min(Np8, 512):
        tile *= 2
    tile_j = tile
    tile_i = tile
    Np = _round_up(N, tile_j)                              # multiple of both tiles
    if Np // tile_i < 2 and tile_i > 8:
        tile_i //= 2

    def _pad_lanes(A):
        return jnp.pad(A, ((0, 0), (0, DA - A.shape[1])))

    Qp = jnp.pad(_pad_lanes(Q), ((0, Np - N), (0, 0)))
    KVp = jnp.pad(_pad_lanes(KV), ((0, Np - N), (0, 0)))
    if Np > N:
        # Padded "points": huge distance term -> zero weight, g = 0 -> no
        # contribution anywhere; padded query rows are sliced off below.
        KVp = KVp.at[N:, D + 1].set(1e30)

    grid = (Np // tile_i, Np // tile_j)

    out = pl.pallas_call(
        _make_gbms_kernel(D),
        out_shape=jax.ShapeDtypeStruct((Np, DA), dtype),
        grid_spec=pltpu.PrefetchScalarGridSpec(
            num_scalar_prefetch=0,
            grid=grid,
            in_specs=[
                pl.BlockSpec((tile_i, DA), lambda i, j: (i, 0)),   # Q'_i
                pl.BlockSpec((tile_j, DA), lambda i, j: (j, 0)),   # KV_j (streamed)
                pl.BlockSpec((tile_i, DA), lambda i, j: (i, 0)),   # KV_i (epilogue)
            ],
            out_specs=pl.BlockSpec((tile_i, DA), lambda i, j: (i, 0)),
        ),
        compiler_params=pltpu.CompilerParams(
            dimension_semantics=("parallel", "arbitrary"),
            vmem_limit_bytes=32 * 1024 * 1024,
        ),
    )(Qp, KVp, KVp)

    return out[:N, :D]


# ---- SPD matrix log / exp (eigendecomposition has no Pallas equivalent) ----
# TODO(synk): torch.linalg.eigh has no clean Pallas lowering; done with jnp.linalg.eigh.
def _spd_log(X):
    S, U = jnp.linalg.eigh(X)
    return (U * jnp.log(S)[..., None, :]) @ jnp.swapaxes(U, -2, -1)


def _spd_exp(X):
    S, U = jnp.linalg.eigh(X)
    return (U * jnp.exp(S)[..., None, :]) @ jnp.swapaxes(U, -2, -1)


def spd_gbms_rnn_forward(X, bandwidth=0.5):
    """Forward pass of SPD_GBMS_RNN.

    X: (N, 1, d, d) or (N, d, d) stack of SPD matrices (float32).
    Returns (N, d, d) updated SPD matrices: exp(log(X_i) + M_i).
    """
    if X.ndim == 4:
        X = jnp.squeeze(X, axis=1)      # only the channel dim (safe for N == 1)
    log_X = _spd_log(X)                 # (N, d, d)
    N, d, _ = log_X.shape
    L = log_X.reshape(N, d * d)

    M_flat = _gbms_mean_shift(L, bandwidth)   # (N, d*d)  -- Pallas hot path
    M = M_flat.reshape(N, d, d)

    # output = expm(X, M) = exp(log(X) + M)
    return _spd_exp(log_X + M)


# ---- pure-JAX reference (direct transcription of the torch forward) ----
def _reference_forward(X, bandwidth):
    if X.ndim == 4:
        X = jnp.squeeze(X, axis=1)
    log_X = _spd_log(X)
    N, d, _ = log_X.shape
    L = log_X.reshape(N, d * d)
    diff = L[None, :, :] - L[:, None, :] + EPS          # [i, j] = L_j - L_i + eps
    pds = jnp.sum(diff * diff, axis=-1)                 # pair_dis ** 2
    W = jnp.exp(-0.5 * pds / (bandwidth * bandwidth))
    rowsum = jnp.sum(W, axis=-1)                        # sum_j W[i, j]
    num = W.T @ L - jnp.sum(W, axis=0)[:, None] * L     # sum_j W[j,i](L_j - L_i)
    M = (num / rowsum[:, None]).reshape(N, d, d)
    return _spd_exp(log_X + M)


if __name__ == "__main__":
    key = jax.random.PRNGKey(0)
    N, d = 8, 4

    # deterministic SPD inputs: A A^T + d*I
    A = jax.random.normal(key, (N, d, d), dtype=jnp.float32)
    X = A @ jnp.swapaxes(A, -2, -1) + d * jnp.eye(d, dtype=jnp.float32)
    X = X[:, None, :, :]                     # (8, 1, 4, 4)

    bandwidth = 0.5                          # nn.Parameter init value

    fwd = jax.jit(spd_gbms_rnn_forward)
    out = fwd(X, bandwidth)
    jax.block_until_ready(out)

    assert out.shape == (N, d, d)
    assert bool(jnp.all(jnp.isfinite(out)))

    ref = _reference_forward(X, bandwidth)
    max_err = float(jnp.max(jnp.abs(out - ref)))
    assert bool(jnp.allclose(out, ref, rtol=2e-2, atol=2e-2)), max_err

    print("KERNEL_OK")
</pallas_src>

<mosaic_0001>
module attributes {stable_mosaic.version = 11 : i64} {
  func.func @kernel(%arg0: i32, %arg1: i32, %arg2: memref<8x128xf32, #tpu.memory_space<vmem>>, %arg3: memref<8x128xf32, #tpu.memory_space<vmem>>, %arg4: memref<8x128xf32, #tpu.memory_space<vmem>>, %arg5: memref<8x128xf32, #tpu.memory_space<vmem>>) attributes {dimension_semantics = [#tpu.dimension_semantics<parallel>, #tpu.dimension_semantics<arbitrary>], iteration_bounds = array<i64: 1, 1>, scalar_prefetch = 0 : i64, scratch_operands = 0 : i64, tpu.core_type = #tpu.core_type<tc>, window_params = [{transform_indices = @transform_0, window_bounds = array<i64: 8, 128>}, {transform_indices = @transform_1, window_bounds = array<i64: 8, 128>}, {transform_indices = @transform_2, window_bounds = array<i64: 8, 128>}, {transform_indices = @transform_3, window_bounds = array<i64: 8, 128>}]} {
    %c0_i32 = arith.constant 0 : i32
    %0 = arith.cmpi eq, %arg1, %c0_i32 : i32
    %1 = arith.extui %0 : i1 to i32
    %c0_i32_0 = arith.constant 0 : i32
    %2 = arith.cmpi ne, %1, %c0_i32_0 : i32
    scf.if %2 {
      %cst_11 = arith.constant 0.000000e+00 : f32
      %16 = vector.broadcast %cst_11 : f32 to vector<8x128xf32>
      %c0_12 = arith.constant 0 : index
      %c0_13 = arith.constant 0 : index
      %17 = vector.load %arg5[%c0_12, %c0_13] : memref<8x128xf32, #tpu.memory_space<vmem>>, vector<8x128xf32>
      tpu.vector_store %arg5[%c0_12, %c0_13], %16 {strides = array<i32>} : memref<8x128xf32, #tpu.memory_space<vmem>>, vector<8x128xf32>,
    } else {
    }
    %c0 = arith.constant 0 : index
    %c0_1 = arith.constant 0 : index
    %3 = vector.load %arg3[%c0, %c0_1] : memref<8x128xf32, #tpu.memory_space<vmem>>, vector<8x128xf32>
    %c0_2 = arith.constant 0 : index
    %c0_3 = arith.constant 0 : index
    %4 = vector.load %arg2[%c0_2, %c0_3] : memref<8x128xf32, #tpu.memory_space<vmem>>, vector<8x128xf32>
    %cst = arith.constant dense<0.000000e+00> : vector<8x8xf32>
    %5 = tpu.matmul %4, %3, %cst {dimension_numbers = #tpu.dot_dimension_numbers<[1], [1], [0], [0], [0, 0, 1, 0], [], []>} : vector<8x128xf32>, vector<8x128xf32>, vector<8x8xf32> -> vector<8x8xf32>
    %6 = math.exp %5 : vector<8x8xf32>
    %c0_4 = arith.constant 0 : index
    %c0_5 = arith.constant 0 : index
    %7 = vector.load %arg5[%c0_4, %c0_5] : memref<8x128xf32, #tpu.memory_space<vmem>>, vector<8x128xf32>
    %8 = arith.truncf %6 : vector<8x8xf32> to vector<8x8xbf16>
    %9 = arith.truncf %3 : vector<8x128xf32> to vector<8x128xbf16>
    %cst_6 = arith.constant dense<0.000000e+00> : vector<8x128xf32>
    %10 = tpu.matmul %8, %9, %cst_6 {dimension_numbers = #tpu.dot_dimension_numbers<[1], [0], [0], [1], [0, 0, 1, 1], [], []>} : vector<8x8xbf16>, vector<8x128xbf16>, vector<8x128xf32> -> vector<8x128xf32>
    %11 = arith.addf %7, %10 : vector<8x128xf32>
    %c0_7 = arith.constant 0 : index
    %c0_8 = arith.constant 0 : index
    %12 = vector.load %arg5[%c0_7, %c0_8] : memref<8x128xf32, #tpu.memory_space<vmem>>, vector<8x128xf32>
    tpu.vector_store %arg5[%c0_7, %c0_8], %11 {strides = array<i32>} : memref<8x128xf32, #tpu.memory_space<vmem>>, vector<8x128xf32>,
    %c0_i32_9 = arith.constant 0 : i32
    %13 = arith.cmpi eq, %arg1, %c0_i32_9 : i32
    %14 = arith.extui %13 : i1 to i32
    %c0_i32_10 = arith.constant 0 : i32
    %15 = arith.cmpi ne, %14, %c0_i32_10 : i32
    scf.if %15 {
      %c0_11 = arith.constant 0 : index
      %c0_12 = arith.constant 0 : index
      %16 = vector.load %arg5[%c0_11, %c0_12] : memref<8x128xf32, #tpu.memory_space<vmem>>, vector<8x128xf32>
      %c0_13 = arith.constant 0 : index
      %c0_14 = arith.constant 0 : index
      %17 = vector.load %arg4[%c0_13, %c0_14] : memref<8x128xf32, #tpu.memory_space<vmem>>, vector<8x128xf32>
      %18 = arith.truncf %17 : vector<8x128xf32> to vector<8x128xbf16>
      %19 = arith.extf %18 : vector<8x128xbf16> to vector<8x128xf32>
      %20 = vector.extract_strided_slice %16 {offsets = [0, 16], sizes = [8, 1], strides = [1, 1]} : vector<8x128xf32> to vector<8x1xf32>
      %21 = vector.extract_strided_slice %16 {offsets = [0, 18], sizes = [8, 1], strides = [1, 1]} : vector<8x128xf32> to vector<8x1xf32>
      %22 = vector.extract_strided_slice %17 {offsets = [0, 18], sizes = [8, 1], strides = [1, 1]} : vector<8x128xf32> to vector<8x1xf32>
      %23 = arith.divf %22, %21 : vector<8x1xf32>
      %24 = vector.broadcast %20 : vector<8x1xf32> to vector<8x128xf32>
      %25 = arith.mulf %24, %19 : vector<8x128xf32>
      %26 = arith.subf %16, %25 : vector<8x128xf32>
      %27 = vector.broadcast %23 : vector<8x1xf32> to vector<8x128xf32>
      %28 = arith.mulf %26, %27 : vector<8x128xf32>
      %c0_15 = arith.constant 0 : index
      %c0_16 = arith.constant 0 : index
      %29 = vector.load %arg5[%c0_15, %c0_16] : memref<8x128xf32, #tpu.memory_space<vmem>>, vector<8x128xf32>
      tpu.vector_store %arg5[%c0_15, %c0_16], %28 {strides = array<i32>} : memref<8x128xf32, #tpu.memory_space<vmem>>, vector<8x128xf32>,
    } else {
    }
    return
  }
  func.func @transform_0(%arg0: i32, %arg1: i32) -> (i32, i32) {
    %c0_i32 = arith.constant 0 : i32
    %c0_i32_0 = arith.constant 0 : i32
    return %arg0, %c0_i32 : i32, i32
  }
  func.func @transform_1(%arg0: i32, %arg1: i32) -> (i32, i32) {
    %c0_i32 = arith.constant 0 : i32
    %c0_i32_0 = arith.constant 0 : i32
    return %arg1, %c0_i32 : i32, i32
  }
  func.func @transform_2(%arg0: i32, %arg1: i32) -> (i32, i32) {
    %c0_i32 = arith.constant 0 : i32
    %c0_i32_0 = arith.constant 0 : i32
    return %arg0, %c0_i32 : i32, i32
  }
  func.func @transform_3(%arg0: i32, %arg1: i32) -> (i32, i32) {
    %c0_i32 = arith.constant 0 : i32
    %c0_i32_0 = arith.constant 0 : i32
    return %arg0, %c0_i32 : i32, i32
  }
}

</mosaic_0001>

<bundles_post_ra>
// kernel: custom-call.3
= control target key start
LH: loop header
LB: loop body
LE: loop exit
PB: predicated region body
PF: predicated region fallthrough
CT: control target
= control target key end

     0   :  { %s1694_s30 = smov 0   ;;  %s1696_s10 = smov 0   ;;  %s2020_s0 = inlined_call_operand.vmem [shape: f32[8,2,2], index: 0, kind: input, shape index: {}]   ;;  %s2021_s1 = inlined_call_operand.vmem [shape: f32[8,2,2], index: 1, kind: input, shape index: {}]   ;;  %s2022_s2 = inlined_call_operand.vmem [shape: f32[8,2,2], index: 2, kind: input, shape index: {}]   ;;  %s2023_s3 = inlined_call_operand.vmem [shape: f32[8,2,2], index: 3, kind: input, shape index: {}]   ;;  %s2024_s4 = inlined_call_operand.vmem [shape: f32[8,2], index: 4, kind: output, shape index: {0}]   ;;  %s2025_s5 = inlined_call_operand.vmem [shape: f32[8,2], index: 5, kind: output, shape index: {1}]   ;;  %s2026_s6 = inlined_call_operand.vmem [shape: f32[8,2,2], index: 6, kind: output, shape index: {2}]   ;;  %s2027_s7 = inlined_call_operand.vmem [shape: f32[8,2,2], index: 7, kind: output, shape index: {3}]   ;;  %s2028_s8 = inlined_call_operand.vmem [shape: f32[8,2,2], index: 8, kind: output, shape index: {4}]   ;;  %s2029_s9 = inlined_call_operand.vmem [shape: f32[8,2,2], index: 9, kind: output, shape index: {5}]  }
   0x1   :  { %s1698_s11 = smov 0  }
   0x2 LB: > { %s1710_s12 = sadd.s32 4294967295, %s1631_s11   ;;  %s1713_s13 = sadd.s32 1, %s1631_s11   ;;  %s1631_s11 = sphi %s1698_s11, %s2048_s11   ;;  %s1627_s10 = sphi %s1696_s10, %s2047_s10   ;;  %s1623_s30 = sphi %s1694_s30, %s2046_s30  }
   0x3   : > { %s20_s14 = sshrl.u32 %s1631_s11, 3  ;;  %s21_s15 = sshrl.u32 %s1713_s13, 3 }
   0x4   : > { %s22_s16 = ssub.s32 %s20_s14, %s21_s15  ;;  %s25_s17 = sadd.s32 1, %s1627_s10 }
   0x5   : > { %p23_p0 = scmp.eq.s32.totalorder %s22_s16, 0  ;;  %p35_p1 = scmp.ne.s32.totalorder %s1627_s10, %s1623_s30 }
   0x6   : > { %p36_p2 = scmp.eq.s32.totalorder %s1710_s12, 7  ;;  %p1492_p4 = scmp.ge.s32.totalorder %s1631_s11, 8 }
   0x7   : > { %s1722_s18 = scalar_select %p23_p0, %s1627_s10, %s25_s17  }
   0x8   : > { %p1724_p3 = por %p36_p2, %p35_p1  ;;  %86 = sbr.rel (%p1492_p4) target bundleno = 17 (0x11), region = 16 }
   0x9   : > { %2030 = sst [smem:[#allocation31_spill]] %s1722_s18  ;;  %s88_s20 = sand.u32 (!%p1492_p4), 1, %s1631_s11  }
   0xa   : > { %s1494_s21 = sshll.u32 (!%p1492_p4), %s1631_s11, 1  ;;  %s1493_s22 = sshll.u32 (!%p1492_p4), %s88_s20, 1 }
   0xb   : > { %s92_s25 = scalar_lea.vmem (!%p1492_p4), %s2020_s0, %s1494_s21  ;;  %s90_s26 = scalar_lea.vmem (!%p1492_p4), [#allocation1], %s1493_s22 }
   0xc   : > { %v108_v0 = vld [vmem:[%s92_s25] sm:$0x3] (!%p1492_p4)  ;;  %s129_s29 = scalar_lea.vmem (!%p1492_p4), %s2021_s1, %s1494_s21  ;;  %s166_s16 = scalar_lea.vmem (!%p1492_p4), %s2022_s2, %s1494_s21 }
   0xd   : > { %109 = vst [vmem:[%s90_s26] sm:$0x3] (!%p1492_p4), %v108_v0  ;;  %v145_v1 = vld [vmem:[%s129_s29] sm:$0x3] (!%p1492_p4)  ;;  %s127_s17 = scalar_lea.vmem (!%p1492_p4), [#allocation3], %s1493_s22  ;;  %s203_s23 = scalar_lea.vmem (!%p1492_p4), %s2023_s3, %s1494_s21 }
   0xe   : > { %146 = vst [vmem:[%s127_s17] sm:$0x3] (!%p1492_p4), %v145_v1  ;;  %v182_v2 = vld [vmem:[%s166_s16] sm:$0x3] (!%p1492_p4)  ;;  %s164_s24 = scalar_lea.vmem (!%p1492_p4), [#allocation5], %s1493_s22  ;;  %s201_s25 = scalar_lea.vmem (!%p1492_p4), [#allocation7], %s1493_s22 }
   0xf   : > { %183 = vst [vmem:[%s164_s24] sm:$0x3] %v182_v2  ;;  %v219_v3 = vld [vmem:[%s203_s23] sm:$0x3] }
  0x10   : > { %220 = vst [vmem:[%s201_s25] sm:$0x3] %v219_v3 }
  0x11 PF: > { %p1501_p5 = scmp.ge.s32.totalorder %s1631_s11, 1  ;;  %p236_p6 = scmp.lt.s32.totalorder %s1631_s11, 9 }
  0x13   : > { %p237_p7 = pnand %p1501_p5, %p236_p6 }
  0x15   : > { %240 = sbr.rel (%p237_p7) target bundleno = 991 (0x3df), region = 140 }
  0x1c   : > { %s259_s26 = sand.u32 1, %s1710_s12   ;;  %s277_s27 = sand.u32 1, %s1623_s30   ;;  %v337_v4 = vlaneseq  ;;  %v1641_v5 = vmov 0.0  }
  0x1d   : > { %s1747_s28 = sshll.u32 %s259_s26, 1  ;;  %s1749_s18 = sshll.u32 %s277_s27, 3  ;;  %332 = vst [vmem:[#allocation10] sm:$0xff] %v1641_v5  ;;  %333 = vst [vmem:[#allocation12] sm:$0xff] %v1641_v5 }
  0x1e   : > { %334 = vst [vmem:[#allocation14] sm:$0xff] %v1641_v5  ;;  %335 = vst [vmem:[#allocation16] sm:$0xff] %v1641_v5  ;;  %v1751_v6 = vand.u32 127, %v337_v4  ;;  %v1753_v7 = vshrl.u32 %v337_v4, 7  ;;  %s261_s11 = scalar_lea.vmem [#allocation1], %s1747_s28  ;;  %s265_s30 = scalar_lea.vmem [#allocation3], %s1747_s28 }
  0x1f   : > { %v304_v8 = vld [vmem:[%s261_s11] sm:$0x3]  ;;  %v308_v9 = vld [vmem:[%s265_s30] sm:$0x3]  ;;  %s269_s21 = scalar_lea.vmem [#allocation5], %s1747_s28  ;;  %s273_s22 = scalar_lea.vmem [#allocation7], %s1747_s28 }
  0x20   : > { %305 = vst [vmem:[#allocation0] sm:$0x3] %v304_v8  ;;  %309 = vst [vmem:[#allocation2] sm:$0x3] %v308_v9  ;;  %v312_v10 = vld [vmem:[%s269_s21] sm:$0x3]  ;;  %v339_v6 = vmov %v1751_v6  ;;  %v342_v7 = vmov %v1753_v7 }
  0x21   : > { %v316_v11 = vld [vmem:[%s273_s22] sm:$0x3]  ;;  %313 = vst [vmem:[#allocation4] sm:$0x3] %v312_v10  ;;  %v352_v6 = vmov %v1751_v6  ;;  %v355_v7 = vmov %v1753_v7  ;;  %s320_s29 = smov [#allocation18]  ;;  %s323_s14 = smov [#allocation19]  ;;  %vm346_vm0 = vcmp.eq.s32.totalorder %v342_v7, %v339_v6 }
  0x22   : > { %317 = vst [vmem:[#allocation6] sm:$0x3] %v316_v11  ;;  %vm359_vm1 = vcmp.eq.s32.totalorder %v355_v7, %v352_v6  ;;  %s336_s15 = smov [#allocation10]  ;;  %s349_s16 = smov [#allocation16]  ;;  %vm1381_vm2 = vcmp.lt.s32.totalorder %v1751_v6, 2  ;;  %v1373_v6 = vmov %v1751_v6  ;;  %v1376_v7 = vmov %v1753_v7 }
  0x23   : > { %s326_s17 = smov [#allocation20]  ;;  %s329_s20 = smov [#allocation21]  ;;  %vm1386_vm3 = vcmp.eq.s32.totalorder %v1376_v7, %v1373_v6  ;;  %v1424_v6 = vmov %v1751_v6  ;;  %v1393_v7 = vmov %v1753_v7 }
  0x24   : > { %v343_v12 = vld [vmem:[%s336_s15] sm:$0x3]  ;;  %s1377_s30 = smov [#allocation18]  ;;  %s1394_s21 = smov [#allocation19]  ;;  %v1390_v6 = vmov %v1751_v6  ;;  %v1427_v7 = vmov %v1753_v7 }
  0x25   : > { %v356_v13 = vld [vmem:[%s349_s16] sm:$0x3]  ;;  %v347_v16 = vsel %vm346_vm0, 1.0, %v343_v12  ;;  %s1411_s22 = smov [#allocation20]  ;;  %v1407_v6 = vmov %v1751_v6  ;;  %v1410_v7 = vmov %v1753_v7  ;;  %vm1437_vm4 = vcmp.eq.s32.totalorder %v1427_v7, %v1424_v6 }
  0x26   : > { %v360_v17 = vsel %vm359_vm1, 1.0, %v356_v13  ;;  %348 = vst [vmem:[%s336_s15] sm:$0x3] %v347_v16 }
  0x27   : > { %v321_v14 = vld [vmem:[#allocation0] sm:$0xff]  ;;  %v324_v15 = vld [vmem:[#allocation2] sm:$0xff]  ;;  %361 = vst [vmem:[%s349_s16] sm:$0x3] %v360_v17 }
  0x28   : > { %322 = vst [vmem:[%s320_s29] sm:$0xff] %v321_v14  ;;  %325 = vst [vmem:[%s323_s14] sm:$0xff] %v324_v15  ;;  %v327_v18 = vld [vmem:[#allocation4] sm:$0xff]  ;;  %s1428_s29 = smov [#allocation21] }
  0x29   : > { %v330_v19 = vld [vmem:[#allocation6] sm:$0xff]  ;;  %328 = vst [vmem:[%s326_s17] sm:$0xff] %v327_v18 }
  0x2a   : > { %331 = vst [vmem:[%s329_s20] sm:$0xff] %v330_v19 }
  0x2f   : > { %v1383_v20 = vld [vmem:[%s1377_s30] sm:$0x3] }
  0x30   : > { %v1400_v21 = vld [vmem:[%s1394_s21] sm:$0x3]  ;;  %v1384_v22 = vsel %vm1381_vm2, %v1383_v20, 0.0 }
  0x31   : > { %v1401_v23 = vsel %vm1381_vm2, %v1400_v21, 0.0  ;;  %v1417_v24 = vld [vmem:[%s1411_s22] sm:$0x3]  ;;  %v1385_v26 = vmul.f32 %v1384_v22, %v1384_v22 }
  0x32   : > { %v1434_v25 = vld [vmem:[%s1428_s29] sm:$0x3]  ;;  %v1402_v27 = vmul.f32 %v1401_v23, %v1401_v23  ;;  %v1418_v28 = vsel %vm1381_vm2, %v1417_v24, 0.0 }
  0x33   : > { %v1435_v29 = vsel %vm1381_vm2, %v1434_v25, 0.0  ;;  %v1419_v30 = vmul.f32 %v1418_v28, %v1418_v28  ;;  %v1387_v33 = vsel %vm1386_vm3, 0.0, %v1385_v26 }
  0x34   : > { %v1404_v31 = vadd.f32 %v1402_v27, %v1385_v26  ;;  %v1436_v32 = vmul.f32 %v1435_v29, %v1435_v29  ;;  %v1403_v34 = vadd.f32 %v1402_v27, %v1387_v33 }
  0x36   : > { %v1421_v35 = vadd.f32 %v1419_v30, %v1404_v31  ;;  %v1420_v36 = vadd.f32 %v1419_v30, %v1403_v34  ;;  %v1438_v37 = vsel %vm1437_vm4, 0.0, %v1436_v32 }
  0x38   : > { %v1440_v38 = vadd.f32 %v1436_v32, %v1421_v35  ;;  %v1439_v39 = vadd.f32 %v1438_v37, %v1420_v36 }
  0x3a   : > { %1441 = vadd.xlane.f32.xlu0 %v1440_v38 }
  0x3e   : > { %1449 = vadd.xlane.f32.xlu0 %v1439_v39 }
  0xc7   : > { %v1442_v40 = vpop.xlane.xlu0 %1441 }
  0xc8   : > { %v1443_v41 = vrot.slane %v1442_v40, 4 }
  0xca   : > { %v1444_v42 = vadd.f32 %v1443_v41, %v1442_v40 }
  0xcb   : > { %v1450_v43 = vpop.xlane.xlu0 %1449 }
  0xcc   : > { %v1445_v44 = vrot.slane %v1444_v42, 2  ;;  %v1451_v45 = vrot.slane %v1450_v43, 4 }
  0xce   : > { %v1452_v46 = vadd.f32 %v1451_v45, %v1450_v43  ;;  %v1446_v47 = vadd.f32 %v1445_v44, %v1444_v42 }
  0xd0   : > { %v1453_v48 = vrot.slane %v1452_v46, 2  ;;  %v1447_v50 = vrot.slane %v1446_v47, 1 }
  0xd2   : > { %v1454_v49 = vadd.f32 %v1453_v48, %v1452_v46  ;;  %v1448_v53 = vadd.f32 %v1447_v50, %v1446_v47 }
  0xd4   : > { %v1455_v51 = vrot.slane %v1454_v49, 1 }
  0xd6   : > { %v1456_v52 = vadd.f32 %v1455_v51, %v1454_v49 }
  0xd8   : > { %1542 = vpush %v1456_v52 }
  0xd9   : > { %1544 = vpush %v1448_v53 }
 0x109   : > { %s1543_s14 = spop %1542 }
 0x10a   : > { %s1545_s15 = spop %1544 }
 0x10b   : > { %s1459_s16 = smul.f32 1e-10, %s1545_s15 }
 0x10d   : > { %p1460_p8 = scmp.le.f32.partialorder %s1543_s14, %s1459_s16 }
 0x10e   : > { %s1787_s17 = smov (!%p1460_p8), 0  }
 0x10f   : > { %1463 = sbr.rel (%p1460_p8) target bundleno = 953 (0x3b9), region = 475 }
 0x116 LB: >> { %s1792_s20 = smov 0   ;;  %s1635_s17 = sphi %s1787_s17, %s2032_s17  }
 0x117 LB: >>> { %s466_s30 = smov [#allocation18]  ;;  %v470_v6 = vmov %v1751_v6  ;;  %v473_v7 = vmov %v1753_v7  ;;  %s486_s21 = smov [#allocation19]  ;;  %vm789_vm14 = vcmp.eq.s32.totalorder %v1753_v7, 0  ;;  %vm801_vm15 = vcmp.eq.s32.totalorder %v1753_v7, 1  ;;  %s1639_s20 = sphi %s1792_s20, %s465_s20  }
 0x118   : >>> { %v490_v6 = vmov %v1751_v6  ;;  %v493_v7 = vmov %v1753_v7  ;;  %v474_v54 = vld [vmem:[%s466_s30] sm:$0x3]  ;;  %vm477_vm5 = vcmp.eq.s32.totalorder %v473_v7, %v470_v6  ;;  %s506_s22 = smov [#allocation21]  ;;  %s467_s29 = smov [#allocation22] }
 0x119   : >>> { %vm497_vm6 = vcmp.eq.s32.totalorder %v493_v7, %v490_v6  ;;  %v510_v6 = vmov %v1751_v6  ;;  %v513_v7 = vmov %v1753_v7  ;;  %v478_v55 = vsel %vm477_vm5, %v474_v54, 0.0  ;;  %v494_v56 = vld [vmem:[%s486_s21] sm:$0x3]  ;;  %s487_s14 = smov [#allocation23]  ;;  %s507_s15 = smov [#allocation24] }
 0x11a   : >>> { %vm517_vm7 = vcmp.eq.s32.totalorder %v513_v7, %v510_v6  ;;  %v479_v57 = vrot.slane %v478_v55, 4  ;;  %v498_v58 = vsel %vm497_vm6, %v494_v56, 0.0  ;;  %v514_v59 = vld [vmem:[%s506_s22] sm:$0x3]  ;;  %s530_s16 = smov [#allocation23]  ;;  %s528_s30 = smov [#allocation22]  ;;  %v579_v6 = vmov %v1751_v6 }
 0x11b   : >>> { %v499_v60 = vrot.slane %v498_v58, 4  ;;  %v518_v61 = vsel %vm517_vm7, %v514_v59, 0.0  ;;  %s532_s21 = smov [#allocation24]  ;;  %s567_s22 = smov [#allocation25]  ;;  %v582_v7 = vmov %v1753_v7  ;;  %v594_v6 = vmov %v1751_v6 }
 0x11c   : >>> { %v480_v62 = vadd.f32 %v479_v57, %v478_v55  ;;  %v519_v63 = vrot.slane %v518_v61, 4  ;;  %v597_v7 = vmov %v1753_v7  ;;  %vm584_vm12 = vcmp.eq.s32.totalorder %v582_v7, %v579_v6  ;;  %s1811_s24 = smov [#allocation20]  ;;  %s1817_s23 = smov [#allocation12] }
 0x11d   : >>> { %v500_v0 = vadd.f32 %v499_v60, %v498_v58  ;;  %vm599_vm13 = vcmp.eq.s32.totalorder %v597_v7, %v594_v6  ;;  %s829_s11 = smov [#allocation29]  ;;  %s1823_s27 = smov [#allocation16]  ;;  %v615_v55 = vld [vmem:[%s1811_s24] sm:$0x3]  ;;  %v692_v6 = vmov %v1751_v6  ;;  %v695_v7 = vmov %v1753_v7 }
 0x11e   : >>> { %v481_v1 = vrot.slane %v480_v62, 2  ;;  %v520_v2 = vadd.f32 %v519_v63, %v518_v61  ;;  %v838_v58 = vld [vmem:[%s1817_s23] sm:$0x3]  ;;  %s607_s26 = smov [#allocation30]  ;;  %s831_s25 = smov [#allocation30]  ;;  %v706_v6 = vmov %v1751_v6  ;;  %v709_v7 = vmov %v1753_v7 }
 0x11f   : >>> { %v501_v3 = vrot.slane %v500_v0, 2  ;;  %v840_v61 = vld [vmem:[%s1823_s27] sm:$0x3]  ;;  %vm699_vm0 = vcmp.eq.s32.totalorder %v695_v7, %v692_v6  ;;  %v665_v6 = vmov %v1751_v6  ;;  %v668_v7 = vmov %v1753_v7  ;;  %s465_s20 = sadd.s32 1, %s1639_s20  }
 0x120   : >>> { %v482_v4 = vadd.f32 %v481_v1, %v480_v62  ;;  %v521_v5 = vrot.slane %v520_v2, 2  ;;  %v679_v6 = vmov %v1751_v6  ;;  %v682_v7 = vmov %v1753_v7  ;;  %p462_p9 = scmp.ge.s32.totalorder %s465_s20, 3  }
 0x121   : >>> { %v502_v8 = vadd.f32 %v501_v3, %v500_v0  ;;  %vm714_vm1 = vcmp.eq.s32.totalorder %v709_v7, %v706_v6  ;;  %vm673_vm3 = vcmp.eq.s32.totalorder %v668_v7, %v665_v6  ;;  %vm686_vm4 = vcmp.eq.s32.totalorder %v682_v7, %v679_v6 }
 0x122   : >>> { %v483_v9 = vrot.slane %v482_v4, 1  ;;  %v522_v10 = vadd.f32 %v521_v5, %v520_v2  ;;  %vm728_vm5 = vcmp.eq.s32.totalorder %v1751_v6, 0  ;;  %vm732_vm6 = vcmp.eq.s32.totalorder %v1751_v6, 1 }
 0x123   : >>> { %v503_v11 = vrot.slane %v502_v8, 1  ;;  %v366_v6 = vmov (%p462_p9), %v1751_v6  ;;  %v369_v7 = vmov (%p462_p9), %v1753_v7 }
 0x124   : >>> { %v484_v12 = vadd.f32 %v483_v9, %v482_v4  ;;  %v523_v13 = vrot.slane %v522_v10, 1  ;;  %v419_v6 = vmov (%p462_p9), %v1751_v6  ;;  %vm381_vm7 = vcmp.eq.s32.totalorder (%p462_p9), %v369_v7, %v366_v6 }
 0x125   : >>> { %v504_v14 = vadd.f32 %v503_v11, %v502_v8  ;;  %v422_v7 = vmov (%p462_p9), %v1753_v7  ;;  %v385_v6 = vmov (%p462_p9), %v1751_v6 }
 0x126   : >>> { %485 = vst [vmem:[%s467_s29] sm:$0x1] %v484_v12  ;;  %v524_v15 = vadd.f32 %v523_v13, %v522_v10  ;;  %s569_s29 = smov [#allocation26]  ;;  %v388_v7 = vmov (%p462_p9), %v1753_v7  ;;  %v402_v6 = vmov (%p462_p9), %v1751_v6 }
 0x127   : >>> { %505 = vst [vmem:[%s487_s14] sm:$0x1] %v504_v14  ;;  %s526_s14 = smov [#allocation27]  ;;  %v405_v7 = vmov (%p462_p9), %v1753_v7 }
 0x128   : >>> { %525 = vst [vmem:[%s507_s15] sm:$0x1] %v524_v15  ;;  %s527_s15 = smov [#allocation28]  ;;  %s571_s14 = smov %s526_s14 }
 0x129   : >>> { %s573_s15 = smov %s527_s15 }
 0x12d   : >>> { %v529_v18 = vld [vmem:[%s528_s30] sm:$0xff]  ;;  %s590_s30 = smov [#allocation28] }
 0x12e   : >>> { %v531_v16 = vld [vmem:[%s530_s16] sm:$0xff]  ;;  %v552_v31 = vand.u32 2147483647, %v529_v18  ;;  %s575_s16 = smov [#allocation27] }
 0x12f   : >>> { %v535_v17 = vmul.f32 2.0, %v531_v16  ;;  %v533_v19 = vld [vmem:[%s532_s21] sm:$0xff]  ;;  %v553_v36 = vand.u32 2147483647, %v531_v16  ;;  %s588_s21 = smov [#allocation29] }
 0x130   : >>> { %v534_v20 = vsub.f32 %v533_v19, %v529_v18  ;;  %v554_v32 = vand.u32 2147483647, %v533_v19 }
 0x131   : >>> { %1593 = vrcp.f32 %v535_v17 }
 0x132   : >>> { %v555_v35 = vmin.f32 %v552_v31, %v554_v32 }
 0x134   : >>> { %v556_v37 = vmul.f32 1.1920929e-08, %v555_v35 }
 0x136   : >>> { %vm557_vm11 = vcmp.le.f32.partialorder %v553_v36, %v556_v37 }
 0x13b   : >>> { %v1594_v21 = vpop.eup %1593 }
 0x13c   : >>> { %v537_v22 = vmul.f32 %v1594_v21, %v534_v20 }
 0x13e   : >>> { %v539_v23 = vmul.f32 %v537_v22, %v537_v22  ;;  %vm538_vm10 = vcmp.ge.f32.partialorder %v537_v22, 0.0 }
 0x140   : >>> { %v540_v24 = vadd.f32 1.0, %v539_v23 }
 0x142   : >>> { %1595 = vrsqrt.f32 %v540_v24  ;;  %vm543_vm8 = vcmp.eq.f32.partialorder %v540_v24, inf  ;;  %v546_v26 = vand.u32 2147483648, %v540_v24  ;;  %vm545_vm9 = vcmp.eq.f32.partialorder %v540_v24, 0.0 }
 0x14c   : >>> { %v1596_v25 = vpop.eup %1595 }
 0x14d   : >>> { %v542_v27 = vmul.f32 %v1596_v25, %v540_v24 }
 0x14f   : >>> { %v544_v28 = vsel %vm543_vm8, %v540_v24, %v542_v27  ;;  %vm434_vm8 = vcmp.eq.s32.totalorder (%p462_p9), %v422_v7, %v419_v6 }
 0x150   : >>> { %v547_v29 = vsel %vm545_vm9, %v546_v26, %v544_v28 }
 0x151   : >>> { %v548_v30 = vxor.u32 2147483648, %v547_v29 }
 0x153   : >>> { %v549_v33 = vsel %vm538_vm10, %v547_v29, %v548_v30 }
 0x154   : >>> { %v550_v34 = vadd.f32 %v549_v33, %v537_v22 }
 0x156   : >>> { %1597 = vrcp.f32 %v550_v34 }
 0x160   : >>> { %v1598_v38 = vpop.eup %1597 }
 0x161   : >>> { %v558_v39 = vsel %vm557_vm11, 0.0, %v1598_v38 }
 0x162   : >>> { %v559_v40 = vmul.f32 %v558_v39, %v558_v39  ;;  %v563_v41 = vmul.f32 %v558_v39, %v531_v16 }
 0x164   : >>> { %v560_v42 = vadd.f32 1.0, %v559_v40  ;;  %v564_v43 = vsub.f32 %v529_v18, %v563_v41  ;;  %v566_v44 = vadd.f32 %v563_v41, %v533_v19 }
 0x166   : >>> { %1599 = vrsqrt.f32 %v560_v42  ;;  %568 = vst [vmem:[%s567_s22] sm:$0xff] %v564_v43  ;;  %570 = vst [vmem:[%s569_s29] sm:$0xff] %v566_v44  ;;  %s605_s22 = smov [#allocation29]  ;;  %s1807_s29 = smov [#allocation18] }
 0x167   : >>> { %v613_v53 = vld [vmem:[%s1807_s29] sm:$0x3] }
 0x170   : >>> { %v1600_v45 = vpop.eup %1599 }
 0x171   : >>> { %572 = vst [vmem:[%s571_s14] sm:$0xff] %v1600_v45  ;;  %v562_v46 = vmul.f32 %v1600_v45, %v558_v39  ;;  %s603_s14 = smov [#allocation30] }
 0x173   : >>> { %574 = vst [vmem:[%s573_s15] sm:$0xff] %v562_v46  ;;  %s1809_s15 = smov [#allocation19] }
 0x174   : >>> { %v614_v54 = vld [vmem:[%s1809_s15] sm:$0x3] }
 0x178   : >>> { %v576_v47 = vld [vmem:[%s575_s16] ss:$0 sm:$0xff]  ;;  %s1813_s16 = smov [#allocation21] }
 0x179   : >>> { %v585_v48 = vsel %vm584_vm12, %v576_v47, 0.0  ;;  %v616_v56 = vld [vmem:[%s1813_s16] sm:$0x3] }
 0x17a   : >>> { %586 = vadd.xlane.f32.xlu0 %v585_v48  ;;  %v591_v49 = vld [vmem:[%s590_s30] ss:$0 sm:$0xff]  ;;  %s1815_s30 = smov [#allocation10] }
 0x17b   : >>> { %v600_v50 = vsel %vm599_vm13, %v591_v49, 0.0  ;;  %v837_v57 = vld [vmem:[%s1815_s30] sm:$0x3] }
 0x17e   : >>> { %601 = vadd.xlane.f32.xlu0 %v600_v50 }
 0x207   : >>> { %v587_v51 = vpop.xlane.xlu0 %586 }
 0x208   : >>> { %589 = vst [vmem:[%s588_s21] sm:$0xff] %v587_v51  ;;  %s1819_s21 = smov [#allocation14] }
 0x209   : >>> { %v839_v59 = vld [vmem:[%s1819_s21] sm:$0x3] }
 0x20b   : >>> { %v602_v52 = vpop.xlane.xlu0 %601 }
 0x20c   : >>> { %604 = vst [vmem:[%s603_s14] sm:$0xff] %v602_v52  ;;  %s1843_s14 = smov [#allocation21] }
 0x20f   : >>> { %v606_v60 = vld [vmem:[%s605_s22] sm:$0xff]  ;;  %s1841_s22 = smov [#allocation20] }
 0x210   : >>> { %v830_v62 = vld [vmem:[%s829_s11] sm:$0xff]  ;;  %v617_v63 = vmul.f32 %v613_v53, %v606_v60  ;;  %v620_v0 = vmul.f32 %v614_v54, %v606_v60  ;;  %v624_v1 = vmul.f32 %v615_v55, %v606_v60  ;;  %v627_v2 = vmul.f32 %v616_v56, %v606_v60  ;;  %s1839_s11 = smov [#allocation10] }
 0x211   : >>> { %v841_v3 = vmul.f32 %v837_v57, %v830_v62  ;;  %v844_v4 = vmul.f32 %v838_v58, %v830_v62  ;;  %v848_v5 = vmul.f32 %v839_v59, %v830_v62  ;;  %v851_v8 = vmul.f32 %v840_v61, %v830_v62 }
 0x213   : >>> { %v608_v9 = vld [vmem:[%s607_s26] sm:$0xff]  ;;  %s635_s26 = smov [#allocation28] }
 0x214   : >>> { %v832_v10 = vld [vmem:[%s831_s25] sm:$0xff]  ;;  %v618_v11 = vmul.f32 %v615_v55, %v608_v9  ;;  %v621_v12 = vmul.f32 %v616_v56, %v608_v9  ;;  %v623_v13 = vmul.f32 %v613_v53, %v608_v9  ;;  %v626_v14 = vmul.f32 %v614_v54, %v608_v9  ;;  %s633_s25 = smov [#allocation27] }
 0x215   : >>> { %v842_v15 = vmul.f32 %v839_v59, %v832_v10  ;;  %v845_v16 = vmul.f32 %v840_v61, %v832_v10  ;;  %v847_v17 = vmul.f32 %v837_v57, %v832_v10  ;;  %v850_v18 = vmul.f32 %v838_v58, %v832_v10  ;;  %v634_v27 = vld [vmem:[%s633_s25] ss:$0 sm:$0xff]  ;;  %s662_s25 = smov [#allocation25] }
 0x216   : >>> { %v619_v19 = vsub.f32 %v617_v63, %v618_v11  ;;  %v622_v20 = vsub.f32 %v620_v0, %v621_v12  ;;  %v625_v21 = vadd.f32 %v624_v1, %v623_v13  ;;  %v628_v22 = vadd.f32 %v627_v2, %v626_v14  ;;  %v636_v28 = vld [vmem:[%s635_s26] ss:$0 sm:$0xff]  ;;  %s661_s26 = smov [#allocation18] }
 0x217   : >>> { %v843_v23 = vsub.f32 %v841_v3, %v842_v15  ;;  %v846_v24 = vsub.f32 %v844_v4, %v845_v16  ;;  %v849_v25 = vadd.f32 %v848_v5, %v847_v17  ;;  %v852_v26 = vadd.f32 %v851_v8, %v850_v18  ;;  %v669_v63 = vld [vmem:[%s662_s25] ss:$0 sm:$0xff]  ;;  %s905_s25 = sadd.s32 (%p462_p9), 1, %s1635_s17  }
 0x218   : >>> { %630 = vst [vmem:[%s1809_s15] sm:$0x3] %v622_v20  ;;  %632 = vst [vmem:[%s1813_s16] sm:$0x3] %v628_v22  ;;  %s1845_s15 = smov [#allocation18]  ;;  %s703_s16 = smov [#allocation26] }
 0x219   : >>> { %629 = vst [vmem:[%s1807_s29] sm:$0x3] %v619_v19  ;;  %631 = vst [vmem:[%s1811_s24] sm:$0x3] %v625_v21  ;;  %s1847_s24 = smov [#allocation14]  ;;  %s1855_s29 = smov [#allocation19]  ;;  %v710_v59 = vld [vmem:[%s703_s16] ss:$0 sm:$0xff] }
 0x21a   : >>> { %853 = vst [vmem:[%s1815_s30] sm:$0x3] %v843_v23  ;;  %854 = vst [vmem:[%s1817_s23] sm:$0x3] %v846_v24  ;;  %s1849_s23 = smov [#allocation12]  ;;  %s689_s30 = smov [#allocation20] }
 0x21b   : >>> { %855 = vst [vmem:[%s1819_s21] sm:$0x3] %v849_v25  ;;  %856 = vst [vmem:[%s1823_s27] sm:$0x3] %v852_v26  ;;  %s1853_s27 = smov [#allocation16]  ;;  %s702_s21 = smov [#allocation21] }
 0x21c   : >>> { %s805_s16 = smov [#allocation19]  ;;  %p458_p10 = scmp.ge.s32.totalorder (%p462_p9), %s905_s25, 15 }
 0x21d   : >> { %s2032_s17 = smov (%p462_p9), %s905_s25 }
 0x21f   : >>> { %v644_v30 = vld [vmem:[%s1843_s14] sm:$0x3] }
 0x220   : >>> { %v643_v29 = vld [vmem:[%s1841_s22] sm:$0x3]  ;;  %v652_v36 = vmul.f32 %v644_v30, %v636_v28  ;;  %v655_v42 = vmul.f32 %v644_v30, %v634_v27 }
 0x221   : >>> { %v641_v31 = vld [vmem:[%s1845_s15] sm:$0x3]  ;;  %v651_v35 = vmul.f32 %v643_v29, %v634_v27  ;;  %v654_v37 = vmul.f32 %v643_v29, %v636_v28 }
 0x222   : >>> { %v859_v32 = vld [vmem:[%s1839_s11] ss:$0 sm:$0xff]  ;;  %v1521_v34 = vld [vmem:[%s1839_s11 + $0x1] ss:$0 sm:$0xff]  ;;  %v645_v48 = vmul.f32 %v641_v31, %v634_v27  ;;  %v648_v49 = vmul.f32 %v641_v31, %v636_v28 }
 0x223   : >>> { %v1520_v33 = vld [vmem:[%s1839_s11 - $0x1] sm:$0x2]  ;;  %v1523_v40 = vld [vmem:[%s1847_s24 + $0x1] sm:$0x1]  ;;  %v653_v47 = vsub.f32 %v651_v35, %v652_v36  ;;  %v656_v53 = vadd.f32 %v655_v42, %v654_v37 }
 0x224   : >>> { %v866_v38 = vsel %vm789_vm14, %v859_v32, %v1520_v33  ;;  %v870_v39 = vld [vmem:[%s1847_s24] ss:$0 sm:$0xff]  ;;  %v878_v43 = vsel %vm801_vm15, %v1521_v34, %v1523_v40  ;;  %v1525_v45 = vld [vmem:[%s1849_s23 + $0x1] ss:$0 sm:$0xff] }
 0x225   : >>> { %v883_v41 = vld [vmem:[%s1849_s23] ss:$0 sm:$0xff]  ;;  %869 = vst [vmem:[%s1839_s11] sm:$0x3] %v866_v38  ;;  %880 = vst [vmem:[%s1847_s24] sm:$0x3] %v878_v43  ;;  %v1527_v51 = vld [vmem:[%s1853_s27 + $0x1] sm:$0x1] }
 0x226   : >>> { %v1524_v44 = vld [vmem:[%s1849_s23 - $0x1] sm:$0x2]  ;;  %1522 = vst [vmem:[%s1839_s11 + $0x1] sm:$0x1] %v870_v39  ;;  %v902_v54 = vsel %vm801_vm15, %v1525_v45, %v1527_v51  ;;  %659 = vst [vmem:[%s1841_s22] sm:$0x3] %v653_v47  ;;  %s676_s11 = smov [#allocation19] }
 0x227   : >>> { %v894_v46 = vld [vmem:[%s1853_s27] ss:$0 sm:$0xff]  ;;  %v890_v50 = vsel %vm789_vm14, %v883_v41, %v1524_v44  ;;  %660 = vst [vmem:[%s1843_s14] sm:$0x3] %v656_v53  ;;  %s1897_s22 = smov [#allocation20]  ;;  %s1642_s14 = smov 1  }
 0x228   : >>> { %v642_v52 = vld [vmem:[%s1855_s29] sm:$0x3]  ;;  %893 = vst [vmem:[%s1849_s23] sm:$0x3] %v890_v50  ;;  %904 = vst [vmem:[%s1853_s27] sm:$0x3] %v902_v54  ;;  %s718_s24 = smov [#allocation19]  ;;  %s1900_s27 = smov [#allocation21] }
 0x229   : >>> { %v646_v55 = vmul.f32 %v642_v52, %v636_v28  ;;  %v649_v56 = vmul.f32 %v642_v52, %v634_v27  ;;  %1526 = vst [vmem:[%s1849_s23 + $0x1] sm:$0x1] %v894_v46  ;;  %s1643_s23 = smov 127  }
 0x22b   : >>> { %v647_v57 = vsub.f32 %v645_v48, %v646_v55  ;;  %v650_v58 = vadd.f32 %v649_v56, %v648_v49 }
 0x22d   : >>> { %657 = vst [vmem:[%s1845_s15] sm:$0x3] %v647_v57  ;;  %658 = vst [vmem:[%s1855_s29] sm:$0x3] %v650_v58  ;;  %v696_v60 = vld [vmem:[%s689_s30] sm:$0x3]  ;;  %s717_s15 = smov [#allocation18]  ;;  %s781_s29 = smov [#allocation18] }
 0x22e   : >>> { %v700_v61 = vsel %vm699_vm0, 0.0, %v696_v60  ;;  %v711_v62 = vld [vmem:[%s702_s21] sm:$0x3] }
 0x22f   : >>> { %701 = vst [vmem:[%s689_s30] sm:$0x3] %v700_v61  ;;  %v715_v0 = vsel %vm714_vm1, %v710_v59, %v711_v62  ;;  %s782_s30 = smov [#allocation20] }
 0x230   : >>> { %716 = vst [vmem:[%s702_s21] sm:$0x3] %v715_v0  ;;  %s806_s21 = smov [#allocation21] }
 0x234   : >>> { %v670_v1 = vld [vmem:[%s661_s26] sm:$0x3] }
 0x235   : >>> { %v683_v2 = vld [vmem:[%s676_s11] sm:$0x3]  ;;  %v674_v3 = vsel %vm673_vm3, %v669_v63, %v670_v1 }
 0x236   : >>> { %v687_v4 = vsel %vm686_vm4, 0.0, %v683_v2  ;;  %675 = vst [vmem:[%s661_s26] sm:$0x3] %v674_v3  ;;  %v755_v5 = vld [vmem:[%s1897_s22] sm:$0x3]  ;;  %s370_s26 = smov (%p462_p9), [#allocation18] }
 0x237   : >>> { %688 = vst [vmem:[%s676_s11] sm:$0x3] %v687_v4  ;;  %756 = vrot.lane.b32.xlu0 %v755_v5, %s1642_s14  ;;  %v751_v11 = vld [vmem:[%s1900_s27] sm:$0x3]  ;;  %s389_s11 = smov (%p462_p9), [#allocation19] }
 0x238   : >>> { %v772_v12 = vld [vmem:[%s1900_s27] sm:$0x3] }
 0x239   : >>> { %v754_v30 = vld [vmem:[%s1897_s22] sm:$0x3] }
 0x23d   : >>> { %v723_v8 = vld [vmem:[%s717_s15] sm:$0x3] }
 0x23e   : >>> { %724 = vrot.lane.b32.xlu1 %v723_v8, %s1642_s14  ;;  %v719_v9 = vld [vmem:[%s718_s24] sm:$0x3] }
 0x23f   : >>> { %v740_v10 = vld [vmem:[%s718_s24] sm:$0x3] }
 0x240   : >>> { %v722_v18 = vld [vmem:[%s717_s15] sm:$0x3] }
 0x242   : >>> { %720 = vrot.lane.b32.xlu1 %v719_v9, %s1642_s14 }
 0x246   : >>> { %741 = vrot.lane.b32.xlu1 %v740_v10, %s1643_s23 }
 0x24a   : >>> { %752 = vrot.lane.b32.xlu1 %v751_v11, %s1642_s14  ;;  %s423_s14 = smov (%p462_p9), [#allocation21] }
 0x24e   : >>> { %773 = vrot.lane.b32.xlu1 %v772_v12, %s1643_s23 }
 0x2a9   : >>> { %v757_v20 = vpop.permute.xlu0 %756 }
 0x2aa   : >>> { %v761_v22 = vsel %vm728_vm5, %v755_v5, %v757_v20 }
 0x2b0   : >>> { %v725_v13 = vpop.permute.xlu1 %724 }
 0x2b1   : >>> { %v729_v14 = vsel %vm728_vm5, %v723_v8, %v725_v13 }
 0x2b4   : >>> { %v721_v15 = vpop.permute.xlu1 %720 }
 0x2b5   : >>> { %v733_v16 = vsel %vm732_vm6, %v721_v15, %v729_v14 }
 0x2b6   : >>> { %v739_v17 = vsel %vm1381_vm2, %v733_v16, 0.0 }
 0x2b7   : >>> { %747 = vst [vmem:[%s717_s15] sm:$0x3] %v739_v17 }
 0x2b8   : >>> { %v742_v19 = vpop.permute.xlu1 %741 }
 0x2b9   : >>> { %v746_v21 = vsel %vm732_vm6, %v722_v18, %v742_v19 }
 0x2ba   : >>> { %748 = vst [vmem:[%s718_s24] sm:$0x3] %v746_v21 }
 0x2bc   : >>> { %v753_v23 = vpop.permute.xlu1 %752 }
 0x2bd   : >>> { %v765_v24 = vsel %vm732_vm6, %v753_v23, %v761_v22 }
 0x2be   : >>> { %v783_v25 = vld [vmem:[%s781_s29] ss:$0 sm:$0xff]  ;;  %v1513_v27 = vld [vmem:[%s781_s29 + $0x1] ss:$0 sm:$0xff]  ;;  %v771_v29 = vsel %vm1381_vm2, %v765_v24, 0.0 }
 0x2bf   : >>> { %v1512_v26 = vld [vmem:[%s781_s29 - $0x1] sm:$0x2]  ;;  %779 = vst [vmem:[%s1897_s22] sm:$0x3] %v771_v29  ;;  %s406_s22 = smov (%p462_p9), [#allocation20] }
 0x2c0   : >>> { %v790_v28 = vsel %vm789_vm14, %v783_v25, %v1512_v26  ;;  %v774_v31 = vpop.permute.xlu1 %773 }
 0x2c1   : >>> { %793 = vst [vmem:[%s781_s29] sm:$0x3] %v790_v28  ;;  %v807_v32 = vld [vmem:[%s805_s16] ss:$0 sm:$0xff]  ;;  %v1517_v34 = vld [vmem:[%s805_s16 + $0x1] ss:$0 sm:$0xff]  ;;  %v778_v35 = vsel %vm732_vm6, %v754_v30, %v774_v31 }
 0x2c2   : >>> { %v1516_v33 = vld [vmem:[%s805_s16 - $0x1] sm:$0x2]  ;;  %780 = vst [vmem:[%s1900_s27] sm:$0x3] %v778_v35 }
 0x2c3   : >>> { %v814_v36 = vsel %vm789_vm14, %v807_v32, %v1516_v33 }
 0x2c4   : >>> { %817 = vst [vmem:[%s805_s16] sm:$0x3] %v814_v36 }
 0x2c6   : >>> { %v794_v37 = vld [vmem:[%s782_s30] ss:$0 sm:$0xff]  ;;  %v1515_v38 = vld [vmem:[%s782_s30 + $0x1] sm:$0x1] }
 0x2c7   : >>> { %1514 = vst [vmem:[%s781_s29 + $0x1] sm:$0x1] %v794_v37  ;;  %v802_v39 = vsel %vm801_vm15, %v1513_v27, %v1515_v38  ;;  %464 = sbr.rel (!%p462_p9) target bundleno = 279 (0x117), region = 470 }
 0x2c8   : >>> { %804 = vst [vmem:[%s782_s30] sm:$0x3] %v802_v39 }
 0x2c9   : >>> { %v818_v40 = vld [vmem:[%s806_s21] ss:$0 sm:$0xff]  ;;  %v1519_v41 = vld [vmem:[%s806_s21 + $0x1] sm:$0x1] }
 0x2ca   : >>> { %1518 = vst [vmem:[%s805_s16 + $0x1] sm:$0x1] %v818_v40  ;;  %v826_v42 = vsel %vm801_vm15, %v1517_v34, %v1519_v41 }
 0x2cb   : >>> { %828 = vst [vmem:[%s806_s21] sm:$0x3] %v826_v42 }
 0x2ce   : >> { %v376_v43 = vld [vmem:[%s370_s26] sm:$0x3] }
 0x2cf   : >> { %v377_v45 = vsel %vm1381_vm2, %v376_v43, 0.0  ;;  %v412_v47 = vld [vmem:[%s406_s22] sm:$0x3] }
 0x2d0   : >> { %v378_v49 = vmul.f32 %v377_v45, %v377_v45  ;;  %v413_v51 = vsel %vm1381_vm2, %v412_v47, 0.0 }
 0x2d1   : >> { %v395_v44 = vld [vmem:[%s389_s11] sm:$0x3]  ;;  %v414_v53 = vmul.f32 %v413_v51, %v413_v51 }
 0x2d2   : >> { %v396_v46 = vsel %vm1381_vm2, %v395_v44, 0.0  ;;  %v429_v48 = vld [vmem:[%s423_s14] sm:$0x3]  ;;  %v382_v56 = vsel %vm381_vm7, 0.0, %v378_v49 }
 0x2d3   : >> { %v397_v50 = vmul.f32 %v396_v46, %v396_v46  ;;  %v430_v52 = vsel %vm1381_vm2, %v429_v48, 0.0 }
 0x2d4   : >> { %v431_v55 = vmul.f32 %v430_v52, %v430_v52 }
 0x2d5   : >> { %v399_v54 = vadd.f32 %v397_v50, %v378_v49  ;;  %v398_v57 = vadd.f32 %v397_v50, %v382_v56 }
 0x2d6   : >> { %v435_v60 = vsel %vm434_vm8, 0.0, %v431_v55 }
 0x2d7   : >> { %v416_v58 = vadd.f32 %v414_v53, %v399_v54  ;;  %v415_v59 = vadd.f32 %v414_v53, %v398_v57 }
 0x2d9   : >> { %v437_v61 = vadd.f32 %v431_v55, %v416_v58  ;;  %v436_v62 = vadd.f32 %v435_v60, %v415_v59 }
 0x2db   : >> { %438 = vadd.xlane.f32.xlu0 %v437_v61 }
 0x2df   : >> { %446 = vadd.xlane.f32.xlu0 %v436_v62 }
 0x368   : >> { %v439_v63 = vpop.xlane.xlu0 %438 }
 0x369   : >> { %v440_v0 = vrot.slane %v439_v63, 4 }
 0x36b   : >> { %v441_v1 = vadd.f32 %v440_v0, %v439_v63 }
 0x36c   : >> { %v447_v2 = vpop.xlane.xlu0 %446 }
 0x36d   : >> { %v442_v3 = vrot.slane %v441_v1, 2  ;;  %v448_v4 = vrot.slane %v447_v2, 4 }
 0x36f   : >> { %v449_v5 = vadd.f32 %v448_v4, %v447_v2  ;;  %v443_v8 = vadd.f32 %v442_v3, %v441_v1 }
 0x371   : >> { %v450_v9 = vrot.slane %v449_v5, 2  ;;  %v444_v11 = vrot.slane %v443_v8, 1 }
 0x373   : >> { %v451_v10 = vadd.f32 %v450_v9, %v449_v5  ;;  %v445_v14 = vadd.f32 %v444_v11, %v443_v8 }
 0x375   : >> { %v452_v12 = vrot.slane %v451_v10, 1 }
 0x377   : >> { %v453_v13 = vadd.f32 %v452_v12, %v451_v10 }
 0x379   : >> { %1546 = vpush %v453_v13 }
 0x37a   : >> { %1548 = vpush %v445_v14 }
 0x3aa   : >> { %s1547_s20 = spop %1546 }
 0x3ab   : >> { %s1549_s15 = spop %1548 }
 0x3ac   : >> { %s456_s24 = smul.f32 1e-10, %s1549_s15 }
 0x3ae   : >> { %p457_p11 = scmp.le.f32.partialorder %s1547_s20, %s456_s24 }
 0x3b0   : >> { %p459_p12 = por %p458_p10, %p457_p11 }
 0x3b2   : > { %907 = sbr.rel (!%p459_p12) target bundleno = 278 (0x116), region = 481 }
 0x3b9 PF: > { %s912_s23 = smov [#allocation18]  ;;  %v916_v6 = vmov %v1751_v6  ;;  %v919_v7 = vmov %v1753_v7  ;;  %v955_v15 = vld [vmem:[#allocation10] sm:$0x3]  ;;  %v961_v16 = vld [vmem:[#allocation12] sm:$0x3]  ;;  %s2033_s17 = scalar_lea.vmem [#allocation11], %s1747_s28 }
 0x3ba   : > { %v936_v6 = vmov %v1751_v6  ;;  %v939_v7 = vmov %v1753_v7  ;;  %v920_v17 = vld [vmem:[%s912_s23] sm:$0x3]  ;;  %vm923_vm9 = vcmp.eq.s32.totalorder %v919_v7, %v916_v6  ;;  %957 = vst [vmem:[%s2033_s17] sm:$0x3] %v955_v15  ;;  %s2034_s27 = scalar_lea.vmem [#allocation13], %s1747_s28  ;;  %v967_v18 = vld [vmem:[#allocation14] sm:$0x3] }
 0x3bb   : > { %vm943_vm10 = vcmp.eq.s32.totalorder %v939_v7, %v936_v6  ;;  %963 = vst [vmem:[%s2034_s27] sm:$0x3] %v961_v16  ;;  %v973_v19 = vld [vmem:[#allocation16] sm:$0x3]  ;;  %v924_v20 = vsel %vm923_vm9, %v920_v17, 0.0  ;;  %s932_s29 = smov [#allocation21]  ;;  %s2035_s16 = scalar_lea.vmem [#allocation15], %s1747_s28 }
 0x3bc   : > { %969 = vst [vmem:[%s2035_s16] sm:$0x3] %v967_v18  ;;  %s2036_s30 = scalar_lea.vmem [#allocation17], %s1747_s28  ;;  %v925_v21 = vrot.slane %v924_v20, 4  ;;  %v940_v22 = vld [vmem:[%s932_s29] sm:$0x3]  ;;  %s908_s21 = sand.u32 7, %s1710_s12  }
 0x3bd   : > { %975 = vst [vmem:[%s2036_s30] sm:$0x3] %v973_v19  ;;  %v944_v23 = vsel %vm943_vm10, %v940_v22, 0.0  ;;  %s2037_s25 = scalar_lea.vmem [#allocation8], %s1749_s18  ;;  %s2038_s11 = scalar_lea.vmem [#allocation9], %s1749_s18 }
 0x3be   : > { %v926_v24 = vadd.f32 %v925_v21, %v924_v20  ;;  %v945_v25 = vrot.slane %v944_v23, 4  ;;  %s909_s26 = scalar_lea.vmem %s2037_s25, %s908_s21 [#allocation8]  ;;  %s911_s22 = scalar_lea.vmem %s2038_s11, %s908_s21 [#allocation9] }
 0x3bf   : > { %s913_s26 = smov %s909_s26  ;;  %s933_s22 = smov %s911_s22 }
 0x3c0   : > { %v927_v6 = vrot.slane %v926_v24, 2  ;;  %v946_v7 = vadd.f32 %v945_v25, %v944_v23  ;;  %s1003_s14 = sshrl.u32 (%p1724_p3), %s1710_s12, 3  ;;  %s2039_s20 = scalar_lea.vmem (%p1724_p3), [#allocation8], %s1749_s18 }
 0x3c1   : > { %s1534_s15 = sshll.u32 (%p1724_p3), %s1003_s14, 3 }
 0x3c2   : > { %v928_v26 = vadd.f32 %v927_v6, %v926_v24  ;;  %v947_v27 = vrot.slane %v946_v7, 2  ;;  %s1005_s17 = scalar_lea.vmem (%p1724_p3), %s2024_s4, %s1534_s15 }
 0x3c4   : > { %v929_v28 = vrot.slane %v928_v26, 1  ;;  %v948_v29 = vadd.f32 %v947_v27, %v946_v7  ;;  %1002 = sbr.rel (!%p1724_p3) target bundleno = 977 (0x3d1), region = 158 }
 0x3c6   : > { %v930_v30 = vadd.f32 %v929_v28, %v928_v26  ;;  %v949_v31 = vrot.slane %v948_v29, 1 }
 0x3c8   : > { %931 = vst [vmem:[%s913_s26] sm:$0x1] %v930_v30  ;;  %v950_v32 = vadd.f32 %v949_v31, %v948_v29 }
 0x3ca   : > { %951 = vst [vmem:[%s933_s22] sm:$0x1] %v950_v32 }
 0x3cf   : > { %v1033_v33 = vld [vmem:[%s2039_s20] sm:$0xff] }
 0x3d0   : > { %1034 = vst [vmem:[%s1005_s17] sm:$0xff] %v1033_v33 }
 0x3d1 PF: > { %1040 = sbr.rel (!%p1724_p3) target bundleno = 985 (0x3d9), region = 196  ;;  %s1041_s27 = sshrl.u32 (%p1724_p3), %s1710_s12, 3 }
 0x3d2   : > { %s2040_s29 = scalar_lea.vmem (%p1724_p3), [#allocation9], %s1749_s18  ;;  %s1535_s16 = sshll.u32 (%p1724_p3), %s1041_s27, 3 }
 0x3d3   : > { %s1043_s25 = scalar_lea.vmem (%p1724_p3), %s2025_s5, %s1535_s16 }
 0x3d7   : > { %v1071_v34 = vld [vmem:[%s2040_s29] sm:$0xff] (%p1724_p3) }
 0x3d8   : > { %1072 = vst [vmem:[%s1043_s25] sm:$0xff] %v1071_v34 }
 0x3d9 PF: > { %s1536_s26 = sshll.u32 %s1710_s12, 1  ;;  %s2041_s19 = scalar_lea.vmem [#allocation11], %s1747_s28 }
 0x3da   : > { %v1093_v35 = vld [vmem:[%s2041_s19] sm:$0x3]  ;;  %s2042_s11 = scalar_lea.vmem [#allocation13], %s1747_s28  ;;  %s1077_s14 = scalar_lea.vmem %s2026_s6, %s1536_s26 }
 0x3db   : > { %v1126_v36 = vld [vmem:[%s2042_s11] sm:$0x3]  ;;  %s1110_s24 = scalar_lea.vmem %s2027_s7, %s1536_s26  ;;  %s2043_s23 = scalar_lea.vmem [#allocation15], %s1747_s28  ;;  %1094 = vst [vmem:[%s1077_s14] sm:$0x3] %v1093_v35 }
 0x3dc   : > { %v1159_v37 = vld [vmem:[%s2043_s23] sm:$0x3]  ;;  %s2044_s17 = scalar_lea.vmem [#allocation17], %s1747_s28  ;;  %1127 = vst [vmem:[%s1110_s24] sm:$0x3] %v1126_v36  ;;  %s1143_s29 = scalar_lea.vmem %s2028_s8, %s1536_s26 }
 0x3dd   : > { %v1192_v38 = vld [vmem:[%s2044_s17] sm:$0x3]  ;;  %s1176_s21 = scalar_lea.vmem %s2029_s9, %s1536_s26  ;;  %1160 = vst [vmem:[%s1143_s29] sm:$0x3] %v1159_v37 }
 0x3de   : > { %1193 = vst [vmem:[%s1176_s21] sm:$0x3] %v1192_v38 }
 0x3df PF: > { %s2045_s25 = sld [smem:[#allocation31_spill]]  ;;  %p13_p13 = scmp.ge.s32.totalorder %s1713_s13, 10  }
 0x3e0   : > { %s2046_s30 = smov %s1627_s10  ;;  %s2048_s11 = smov %s1713_s13 }
 0x3e1   :  { %15 = sbr.rel (!%p13_p13) target bundleno = 2 (0x2), region = 492 }
 0x3e5   : > { %s2047_s10 = smov %s2045_s25 }

// kernel: spd_gbms_rnn_forward.1
= control target key start
LH: loop header
LB: loop body
LE: loop exit
PB: predicated region body
PF: predicated region fallthrough
CT: control target
= control target key end

     0   :  { %v200_v0 = vmov 0.0   ;;  %vm201_vm0 = vmmov 0   ;;  %vm101_vm1 = vcmask 1043456   ;;  %vm97_vm2 = vcmask 64512   ;;  %s236_s1 = inlined_call_operand.vmem [shape: f32[8,128], index: 1, kind: input, shape index: {}, may-alias: {1,2}]   ;;  %s237_s0 = inlined_call_operand.vmem [shape: f32[8,128], index: 0, kind: input, shape index: {}]   ;;  %s238_s2 = inlined_call_operand.vmem [shape: f32[8,128], index: 2, kind: input, shape index: {}, may-alias: {1,2}]   ;;  %s239_s3 = inlined_call_operand.vmem [shape: f32[8,128], index: 3, kind: output, shape index: {}]  }
   0x1   :  { %179 = vmatprep.subr.mxu0 %v200_v0  ;;  %v20_v1 = vld [vmem:[%s236_s1] sm:$0xff]  ;;  %181 = vmatprep.mubr.msk.f32.mxu0 %vm201_vm0, %v200_v0  ;;  %v202_v10 = vmov 16   ;;  %v203_v15 = vmov 18  }
   0x2   :  { %180 = vmatpush3.xpose.msra.mxu0 %v20_v1  ;;  %v21_v2 = vld [vmem:[%s237_s0] sm:$0xff]  ;;  %184 = vmatprep.subr.bf16.mxu1 %v200_v0  ;;  %v96_v3 = vpack.c.bf16 %v20_v1, %v20_v1 }
   0x3   :  { %186 = vmatprep.mubr.msk.bf16.mxu1 %vm201_vm0, %v200_v0  ;;  %194 = vset.pattern.permute.xlu0 %v202_v10  ;;  %v151_v16 = vld [vmem:[%s238_s2] sm:$0xff] }
   0x4   :  { %v103_v4 = vsel %vm101_vm1, %v96_v3, 0  ;;  %v152_v19 = vpack.c.bf16 %v151_v16, %v151_v16 }
   0x5   :  { %182 = vmatmul.mubr.f32.vlgmr.msra.gmra.mrb[0].mxu0 %v21_v2  ;;  %185 = vmatpush3.bf16.msra.mxu1 %v103_v4 }
   0x6   :  { %v153_v20 = vunpack.c.l.bf16 %v152_v19 }
  0xd8   :  { %v88_v5 = vpop.f32.mrb[0].mxu0 }
  0xd9   :  { %v92_v6 = vmul.f32 1.442695, %v88_v5  ;;  %v183_v7 = vpop.f32.mrb[1].mxu0 }
  0xdb   :  { %196 = vpow2.f32 %v92_v6 }
  0xe5   :  { %v197_v8 = vpop.eup %196 }
  0xe6   :  { %v95_v9 = vpack.c.bf16 %v197_v8, %v197_v8 }
  0xe8   :  { %187 = vmatmul.mubr.msk.bf16.vlgmr.msra.gmra.mrb[0].mxu1 %vm97_vm2, %v95_v9 }
 0x1bb   :  { %v139_v11 = vpop.f32.mrb[0].mxu1 }
 0x1bc   :  { %v188_v12 = vpop.f32.mrb[1].mxu1  ;;  %158 = vperm.xlu0 %194, %v139_v11   ;;  %198 = vrcp.f32 %v139_v11 }
 0x1bd   :  { %v142_v13 = vpop.f32.mrb[2].mxu1 }
 0x1be   :  { %v189_v14 = vpop.f32.mrb[3].mxu1 }
 0x1c0   :  { %195 = vset.pattern.permute.xlu0 %v203_v15 }
 0x1c6   :  { %v199_v17 = vpop.eup %198 }
 0x1c7   :  { %v155_v18 = vmul.f32 %v199_v17, %v151_v16 }
 0x1c9   :  { %165 = vperm.xlu0 %195, %v155_v18  }
 0x23b   :  { %v159_v21 = vpop.permute.xlu0 %158 }
 0x23c   :  { %v161_v22 = vmul.f32 %v159_v21, %v153_v20 }
 0x23e   :  { %v162_v23 = vsub.f32 %v139_v11, %v161_v22 }
 0x248   :  { %v166_v24 = vpop.permute.xlu0 %165 }
 0x249   :  { %v168_v25 = vmul.f32 %v166_v24, %v162_v23 }
 0x24b   :  { %169 = vst [vmem:[%s239_s3] sm:$0xff] %v168_v25 }

</bundles_post_ra>
